<compile_context>
chip_gen: v7x
topology: tpu7x:2x2x1
jax: 0.10.0
libtpu: 0.0.40
codegen_flags: <defaults>
</compile_context>

<pallas_src>
import jax
import jax.numpy as jnp
from jax.experimental import pallas as pl
from jax.experimental.pallas import tpu as pltpu

LANE = 128


def _round_up(n, m):
    return ((n + m - 1) // m) * m


def dqn_kernel(x_ref, w1_ref, b1_ref, w2_ref, b2_ref, w3_ref, b3_ref, o_ref):
    # Hoist bias loads once per grid step (broadcasts are not CSE'd by JAX).
    b1 = b1_ref[...]
    b2 = b2_ref[...]
    b3 = b3_ref[...]  # lane-padded (1, 128); only the first out_dim cols are real

    # linear1 + clamp(min=0)   (f32 accumulation on the MXU)
    h1 = jnp.dot(x_ref[...], w1_ref[...], preferred_element_type=jnp.float32)
    h1 = jnp.maximum(h1 + b1, 0.0)

    # linear2 + clamp(min=0)
    h2 = jnp.dot(h1.astype(w2_ref.dtype), w2_ref[...],
                 preferred_element_type=jnp.float32)
    h2 = jnp.maximum(h2 + b2, 0.0)

    # linear3 (no activation). Compute 128-lane wide in VMEM (padded W3/b3),
    # but store only the real out_dim columns -> narrow HBM writeback.
    y = jnp.dot(h2.astype(w3_ref.dtype), w3_ref[...],
                preferred_element_type=jnp.float32) + b3
    out_dim = o_ref.shape[-1]
    # TODO(synk): optionally fuse the DQN consumer (argmax / max-Q over the 2
    # actions) here to shrink the output to <=4 B/row.
    o_ref[...] = y[:, :out_dim].astype(o_ref.dtype)


def prepare_params(params, *, use_bf16=False):
    """One-time weight preparation (hoisted out of the per-call hot path).

    - W3 / b3 are zero-padded to a lane-dense (multiple-of-128) column count so
      the final matmul + bias add are full-lane in VMEM; the kernel stores only
      the real columns to HBM.
    - use_bf16 casts the weight matrices to bf16 (v6e/v7x only — skip on v5e,
      whose VPU has no bf16). Biases stay f32; MXU accumulation stays f32.
    """
    out_dim = params["w3"].shape[1]
    padded = _round_up(max(out_dim, LANE), LANE)
    w3p = jnp.zeros((params["w3"].shape[0], padded), params["w3"].dtype)
    w3p = w3p.at[:, :out_dim].set(params["w3"])
    b3p = jnp.zeros((1, padded), params["b3"].dtype)
    b3p = b3p.at[:, :out_dim].set(params["b3"])

    wdt = jnp.bfloat16 if use_bf16 else jnp.float32
    return {
        "w1": params["w1"].astype(wdt), "b1": params["b1"],
        "w2": params["w2"].astype(wdt), "b2": params["b2"],
        "w3": w3p.astype(wdt), "b3": b3p,
        "out_dim": out_dim,  # python int, used only for shapes
    }


def dqn_forward(x, prep, *, block_b=4096):
    """x: (B, inputs) f32; prep: output of prepare_params().

    block_b: max batch-tile rows per grid step (rounded to a multiple of 8).
    """
    B, in_dim = x.shape
    out_dim = prep["out_dim"]

    if x.dtype != prep["w1"].dtype:
        x = x.astype(prep["w1"].dtype)

    B_up8 = _round_up(B, 8)
    bm = min(_round_up(block_b, 8), B_up8)
    # v7x megacore: guarantee >=2 grid steps when the batch allows it so the
    # "parallel" batch axis lands on both TensorCores (neutral on v5e/v6e).
    if pl.cdiv(B_up8, bm) < 2 and B_up8 > 8:
        bm = _round_up(pl.cdiv(B_up8, 2), 8)
    grid = (pl.cdiv(B, bm),)

    vmem = pltpu.MemorySpace.VMEM
    # Weights / biases: full-array blocks with constant index_map -> stay
    # VMEM-resident across all batch-grid steps (no re-DMA).
    resident = lambda a: pl.BlockSpec(a.shape, lambda i: (0,) * a.ndim,
                                      memory_space=vmem)

    out = pl.pallas_call(
        dqn_kernel,
        # Narrow HBM output: out_dim equals the full last dim, so the BlockSpec
        # is legal and writeback is only out_dim * 4 bytes per row.
        out_shape=jax.ShapeDtypeStruct((B, out_dim), jnp.float32),
        grid=grid,
        in_specs=[
            pl.BlockSpec((bm, in_dim), lambda i: (i, 0), memory_space=vmem),
            resident(prep["w1"]), resident(prep["b1"]),
            resident(prep["w2"]), resident(prep["b2"]),
            resident(prep["w3"]), resident(prep["b3"]),
        ],
        out_specs=pl.BlockSpec((bm, out_dim), lambda i: (i, 0),
                               memory_space=vmem),
        compiler_params=pltpu.CompilerParams(
            dimension_semantics=("parallel",)),  # 2x on v7x megacore
    )(x, prep["w1"], prep["b1"], prep["w2"], prep["b2"],
      prep["w3"], prep["b3"])

    return out


def init_dqn_params(key, inputs, outputs):
    """Deterministic init mimicking PyTorch nn.Linear default U(-1/sqrt(fan_in), +)."""
    def linear(key, fan_in, fan_out):
        kw, kb = jax.random.split(key)
        bound = 1.0 / jnp.sqrt(jnp.float32(fan_in))
        # stored already transposed: (in, out)
        w = jax.random.uniform(kw, (fan_in, fan_out), jnp.float32, -bound, bound)
        b = jax.random.uniform(kb, (1, fan_out), jnp.float32, -bound, bound)
        return w, b

    k1, k2, k3 = jax.random.split(key, 3)
    w1, b1 = linear(k1, inputs, 16)
    w2, b2 = linear(k2, 16, 32)
    w3, b3 = linear(k3, 32, outputs)
    return {"w1": w1, "b1": b1, "w2": w2, "b2": b2, "w3": w3, "b3": b3}


def _reference(x, params):
    h1 = jnp.maximum(x @ params["w1"] + params["b1"], 0.0)
    h2 = jnp.maximum(h1 @ params["w2"] + params["b2"], 0.0)
    return h2 @ params["w3"] + params["b3"]


if __name__ == "__main__":
    # CartPole-style shapes: 4 observation features -> 2 actions.
    INPUTS, OUTPUTS = 4, 2
    key = jax.random.PRNGKey(0)
    kx, kp, kx2, kx3 = jax.random.split(key, 4)
    params = init_dqn_params(kp, INPUTS, OUTPUTS)
    prep_f32 = prepare_params(params)                  # one-time, out of hot path

    # Case 1: small acting batch (B=8), single grid step, pure f32.
    B = 8
    x = jax.random.normal(kx, (B, INPUTS), dtype=jnp.float32)
    y = dqn_forward(x, prep_f32)
    jax.block_until_ready(y)
    y_ref = _reference(x, params)
    assert y.shape == (B, OUTPUTS)
    assert jnp.allclose(y, y_ref, atol=1e-5, rtol=1e-5)

    # Case 2: multi-step batch grid with a partial boundary block
    # (B=40, tile=16 -> grid=3, last block masked), f32.
    B2 = 40
    x2 = jax.random.normal(kx2, (B2, INPUTS), dtype=jnp.float32)
    y2 = dqn_forward(x2, prep_f32, block_b=16)
    jax.block_until_ready(y2)
    y2_ref = _reference(x2, params)
    assert y2.shape == (B2, OUTPUTS)
    assert jnp.allclose(y2, y2_ref, atol=1e-5, rtol=1e-5)

    # Case 3: B not a multiple of 8 (B=13); v7x 2-step split kicks in
    # (bm=8, grid=2) and out-of-bounds rows are masked on store.
    B3 = 13
    x3 = jax.random.normal(kx3, (B3, INPUTS), dtype=jnp.float32)
    y3 = dqn_forward(x3, prep_f32)
    jax.block_until_ready(y3)
    y3_ref = _reference(x3, params)
    assert y3.shape == (B3, OUTPUTS)
    assert jnp.allclose(y3, y3_ref, atol=1e-5, rtol=1e-5)

    # Case 4: bf16 operand path (v6e/v7x only — not recommended on v5e),
    # f32 accumulation; activations h1/h2 are also bf16-quantized.
    prep_bf16 = prepare_params(params, use_bf16=True)
    y4 = dqn_forward(x2, prep_bf16, block_b=16)
    jax.block_until_ready(y4)
    assert jnp.allclose(y4, y2_ref, atol=5e-2, rtol=5e-2)

    print("KERNEL_OK")
</pallas_src>

<mosaic_0001>
module attributes {stable_mosaic.version = 11 : i64} {
  func.func @dqn_kernel(%arg0: i32, %arg1: memref<8x4xf32, #tpu.memory_space<vmem>>, %arg2: memref<4x16xf32, #tpu.memory_space<vmem>>, %arg3: memref<1x16xf32, #tpu.memory_space<vmem>>, %arg4: memref<16x32xf32, #tpu.memory_space<vmem>>, %arg5: memref<1x32xf32, #tpu.memory_space<vmem>>, %arg6: memref<32x128xf32, #tpu.memory_space<vmem>>, %arg7: memref<1x128xf32, #tpu.memory_space<vmem>>, %arg8: memref<8x2xf32, #tpu.memory_space<vmem>>) attributes {dimension_semantics = [#tpu.dimension_semantics<parallel>], iteration_bounds = array<i64: 1>, scalar_prefetch = 0 : i64, scratch_operands = 0 : i64, tpu.core_type = #tpu.core_type<tc>, window_params = [{transform_indices = @transform_0, window_bounds = array<i64: 8, 4>}, {pipeline_mode = #tpu.pipeline_mode<synchronous>, transform_indices = @transform_1, window_bounds = array<i64: 4, 16>}, {pipeline_mode = #tpu.pipeline_mode<synchronous>, transform_indices = @transform_2, window_bounds = array<i64: 1, 16>}, {pipeline_mode = #tpu.pipeline_mode<synchronous>, transform_indices = @transform_3, window_bounds = array<i64: 16, 32>}, {pipeline_mode = #tpu.pipeline_mode<synchronous>, transform_indices = @transform_4, window_bounds = array<i64: 1, 32>}, {pipeline_mode = #tpu.pipeline_mode<synchronous>, transform_indices = @transform_5, window_bounds = array<i64: 32, 128>}, {pipeline_mode = #tpu.pipeline_mode<synchronous>, transform_indices = @transform_6, window_bounds = array<i64: 1, 128>}, {transform_indices = @transform_7, window_bounds = array<i64: 8, 2>}]} {
    %c0 = arith.constant 0 : index
    %c0_0 = arith.constant 0 : index
    %0 = vector.load %arg3[%c0, %c0_0] : memref<1x16xf32, #tpu.memory_space<vmem>>, vector<1x16xf32>
    %c0_1 = arith.constant 0 : index
    %c0_2 = arith.constant 0 : index
    %1 = vector.load %arg5[%c0_1, %c0_2] : memref<1x32xf32, #tpu.memory_space<vmem>>, vector<1x32xf32>
    %c0_3 = arith.constant 0 : index
    %c0_4 = arith.constant 0 : index
    %2 = vector.load %arg7[%c0_3, %c0_4] : memref<1x128xf32, #tpu.memory_space<vmem>>, vector<1x128xf32>
    %c0_5 = arith.constant 0 : index
    %c0_6 = arith.constant 0 : index
    %3 = vector.load %arg1[%c0_5, %c0_6] : memref<8x4xf32, #tpu.memory_space<vmem>>, vector<8x4xf32>
    %c0_7 = arith.constant 0 : index
    %c0_8 = arith.constant 0 : index
    %4 = vector.load %arg2[%c0_7, %c0_8] : memref<4x16xf32, #tpu.memory_space<vmem>>, vector<4x16xf32>
    %cst = arith.constant dense<0.000000e+00> : vector<8x16xf32>
    %5 = tpu.matmul %3, %4, %cst {dimension_numbers = #tpu.dot_dimension_numbers<[1], [0], [0], [1], [0, 0, 1, 1], [], []>} : vector<8x4xf32>, vector<4x16xf32>, vector<8x16xf32> -> vector<8x16xf32>
    %6 = vector.broadcast %0 : vector<1x16xf32> to vector<8x16xf32>
    %7 = arith.addf %5, %6 : vector<8x16xf32>
    %cst_9 = arith.constant 0.000000e+00 : f32
    %8 = vector.broadcast %cst_9 : f32 to vector<8x16xf32>
    %9 = arith.maximumf %7, %8 : vector<8x16xf32>
    %c0_10 = arith.constant 0 : index
    %c0_11 = arith.constant 0 : index
    %10 = vector.load %arg4[%c0_10, %c0_11] : memref<16x32xf32, #tpu.memory_space<vmem>>, vector<16x32xf32>
    %cst_12 = arith.constant dense<0.000000e+00> : vector<8x32xf32>
    %11 = tpu.matmul %9, %10, %cst_12 {dimension_numbers = #tpu.dot_dimension_numbers<[1], [0], [0], [1], [0, 0, 1, 1], [], []>} : vector<8x16xf32>, vector<16x32xf32>, vector<8x32xf32> -> vector<8x32xf32>
    %12 = vector.broadcast %1 : vector<1x32xf32> to vector<8x32xf32>
    %13 = arith.addf %11, %12 : vector<8x32xf32>
    %cst_13 = arith.constant 0.000000e+00 : f32
    %14 = vector.broadcast %cst_13 : f32 to vector<8x32xf32>
    %15 = arith.maximumf %13, %14 : vector<8x32xf32>
    %c0_14 = arith.constant 0 : index
    %c0_15 = arith.constant 0 : index
    %16 = vector.load %arg6[%c0_14, %c0_15] : memref<32x128xf32, #tpu.memory_space<vmem>>, vector<32x128xf32>
    %cst_16 = arith.constant dense<0.000000e+00> : vector<8x128xf32>
    %17 = tpu.matmul %15, %16, %cst_16 {dimension_numbers = #tpu.dot_dimension_numbers<[1], [0], [0], [1], [0, 0, 1, 1], [], []>} : vector<8x32xf32>, vector<32x128xf32>, vector<8x128xf32> -> vector<8x128xf32>
    %18 = vector.broadcast %2 : vector<1x128xf32> to vector<8x128xf32>
    %19 = arith.addf %17, %18 : vector<8x128xf32>
    %20 = vector.extract_strided_slice %19 {offsets = [0, 0], sizes = [8, 2], strides = [1, 1]} : vector<8x128xf32> to vector<8x2xf32>
    %c0_17 = arith.constant 0 : index
    %c0_18 = arith.constant 0 : index
    %21 = vector.load %arg8[%c0_17, %c0_18] : memref<8x2xf32, #tpu.memory_space<vmem>>, vector<8x2xf32>
    tpu.vector_store %arg8[%c0_17, %c0_18], %20 {strides = array<i32>} : memref<8x2xf32, #tpu.memory_space<vmem>>, vector<8x2xf32>,
    return
  }
  func.func @transform_0(%arg0: i32) -> (i32, i32) {
    %c0_i32 = arith.constant 0 : i32
    %c0_i32_0 = arith.constant 0 : i32
    return %arg0, %c0_i32 : i32, i32
  }
  func.func @transform_1(%arg0: i32) -> (i32, i32) {
    %c0_i32 = arith.constant 0 : i32
    %c0_i32_0 = arith.constant 0 : i32
    %c0_i32_1 = arith.constant 0 : i32
    return %c0_i32, %c0_i32_0 : i32, i32
  }
  func.func @transform_2(%arg0: i32) -> (i32, i32) {
    %c0_i32 = arith.constant 0 : i32
    %c0_i32_0 = arith.constant 0 : i32
    %c0_i32_1 = arith.constant 0 : i32
    return %c0_i32, %c0_i32_0 : i32, i32
  }
  func.func @transform_3(%arg0: i32) -> (i32, i32) {
    %c0_i32 = arith.constant 0 : i32
    %c0_i32_0 = arith.constant 0 : i32
    %c0_i32_1 = arith.constant 0 : i32
    return %c0_i32, %c0_i32_0 : i32, i32
  }
  func.func @transform_4(%arg0: i32) -> (i32, i32) {
    %c0_i32 = arith.constant 0 : i32
    %c0_i32_0 = arith.constant 0 : i32
    %c0_i32_1 = arith.constant 0 : i32
    return %c0_i32, %c0_i32_0 : i32, i32
  }
  func.func @transform_5(%arg0: i32) -> (i32, i32) {
    %c0_i32 = arith.constant 0 : i32
    %c0_i32_0 = arith.constant 0 : i32
    %c0_i32_1 = arith.constant 0 : i32
    return %c0_i32, %c0_i32_0 : i32, i32
  }
  func.func @transform_6(%arg0: i32) -> (i32, i32) {
    %c0_i32 = arith.constant 0 : i32
    %c0_i32_0 = arith.constant 0 : i32
    %c0_i32_1 = arith.constant 0 : i32
    return %c0_i32, %c0_i32_0 : i32, i32
  }
  func.func @transform_7(%arg0: i32) -> (i32, i32) {
    %c0_i32 = arith.constant 0 : i32
    %c0_i32_0 = arith.constant 0 : i32
    return %arg0, %c0_i32 : i32, i32
  }
}

</mosaic_0001>

<bundles_post_ra>
// kernel: tpu_custom_call.1
= control target key start
LH: loop header
LB: loop body
LE: loop exit
PB: predicated region body
PF: predicated region fallthrough
CT: control target
= control target key end

     0   :  { %12 = vsyncpa [#allocation3], 0  ;;  %s383_s24 = smov [#allocation2]   ;;  %s465_s0 = inlined_call_operand.vmem [shape: f32[8,4], index: 0, kind: input, shape index: {}]   ;;  %s466_s1 = inlined_call_operand.vmem [shape: f32[4,16], index: 1, kind: input, shape index: {}]   ;;  %s467_s2 = inlined_call_operand.vmem [shape: f32[1,16], index: 2, kind: input, shape index: {}]   ;;  %s468_s3 = inlined_call_operand.vmem [shape: f32[16,32], index: 3, kind: input, shape index: {}]   ;;  %s469_s4 = inlined_call_operand.vmem [shape: f32[1,32], index: 4, kind: input, shape index: {}]   ;;  %s470_s5 = inlined_call_operand.hbm [shape: f32[32,128], index: 5, kind: input, shape index: {}]   ;;  %s471_s6 = inlined_call_operand.vmem [shape: f32[1,128], index: 6, kind: input, shape index: {}]   ;;  %s472_s7 = inlined_call_operand.vmem [shape: f32[8,2], index: 7, kind: output, shape index: {}]  }
   0x1   :  { %s28_s25 = sshll.u32 %s383_s24, 4  ;;  %s359_s28 = scalar_lea.hbm %s470_s5, 512  ;;  %s29_s25 = int_to_ptr.vmem [resolvable:$true] %s28_s25 }
   0x2   :  { %p360_p0 = scmp.ne.s32.totalorder %s470_s5, %s359_s28  ;;  %p363_p1 = scmp.lt.u32.totalorder %s359_s28, %s470_s5 }
   0x4   :  { %p365_p2 = pnand %p363_p1, %p360_p0 }
   0x6   :  { %368 = shalt.err (!%p365_p2)
}
   0x7   :  { %s369_s10 = scalar_lea.vmem %s29_s25, 512  ;;  %p374_p4 = scmp.lt.s32.totalorder %s29_s25, %s29_s25 }
   0x8   :  { %p370_p3 = scmp.ne.s32.totalorder %s29_s25, %s369_s10  ;;  %p375_p5 = scmp.lt.s32.totalorder %s369_s10, %s369_s10 }
   0xa   :  { %p376_p6 = por %p375_p5, %p374_p4 }
   0xc   :  { %p377_p7 = pnand %p376_p6, %p370_p3 }
   0xe   :  { %380 = shalt.err (!%p377_p7)
}
   0xf   :  { %s384_s11 = smov 128   ;;  %s385_s12 = smov 8  }
  0x10   :  { %34 = dma.hbm_to_vmem [thread:$0]  %s470_s5, 512, %s29_s25, [#allocation3], %s384_s11, %s384_s11, %s385_s12  }
  0x11   :  { %381 = dma.done.wait [#allocation3], 512  }
  0x12   :  { %382 = vsyncadd [#allocation3], 4294966784  ;;  %v386_v0 = vmov 0.0   ;;  %vm387_vm0 = vmmov 0   ;;  %vm55_vm1 = vcmask 1043456   ;;  %vm51_vm2 = vcmask 31744  }
  0x13   :  { %321 = vmatprep.subr.mxu1 %v386_v0  ;;  %323 = vmatprep.mubr.msk.f32.mxu1 %vm387_vm0, %v386_v0  ;;  %v44_v1 = vld [vmem:[%s466_s1] sm:$0xf]  ;;  %v131_v4 = vld [vmem:[%s468_s3 + $0x8] sm:$0xff]  ;;  %v388_v6 = vmov 0.0|0.0   ;;  %v213_v7 = vld [vmem:[#allocation2] sm:$0xff]  ;;  %vm138_vm3 = vcmask 130048  }
  0x14   :  { %341 = vmatprep.mubr.msk.f32.mxu0 %vm387_vm0, %v386_v0  ;;  %v43_v2 = vld [vmem:[%s465_s0] sm:$0xff]  ;;  %322 = vmatpush3.msk.msra.mxu1 %vm55_vm1, %v44_v1  ;;  %v214_v8 = vld [vmem:[#allocation2 + $0x8] sm:$0xff]  ;;  %v216_v16 = vld [vmem:[#allocation2 + $0x18] sm:$0xff]  ;;  %vm223_vm4 = vcmask 261120   ;;  %vm297_vm5 = vcmask 15360  }
  0x15   :  { %324 = vmatmul.mubr.msk.f32.vlgmr.msra.gmra.mrb[0].mxu1 %vm51_vm2, %v43_v2  ;;  %v130_v3 = vld [vmem:[%s468_s3] sm:$0xff]  ;;  %344 = vmatprep.subr.bf16.mxu1 %v388_v6  ;;  %v348_v9 = vpack.c.bf16 %v214_v8, %v213_v7 }
  0x16   :  { %330 = vmatprep.mubr.msk.f32.mxu1 %vm387_vm0, %v386_v0  ;;  %v345_v5 = vpack.c.bf16 %v131_v4, %v130_v3  ;;  %347 = vmatprep.subr.bf16.mxu0 %v388_v6  ;;  %v304_v10 = vld [vmem:[%s467_s2] ss:$0 sm:$0xff] }
  0x17   :  { %349 = vmatpush3.bf16.msra.mxu0 %v348_v9  ;;  %v215_v15 = vld [vmem:[#allocation2 + $0x10] sm:$0xff] }
  0x18   :  { %346 = vmatpush3.bf16.msra.mxu1 %v345_v5  ;;  %350 = vmatprep.subr.bf16.mxu0 %v388_v6  ;;  %v351_v17 = vpack.c.bf16 %v216_v16, %v215_v15  ;;  %v307_v18 = vld [vmem:[%s469_s4] ss:$0 sm:$0xff] }
  0x19   :  { %v309_v23 = vld [vmem:[%s471_s6] ss:$0 sm:$0xff] }
  0x1b   :  { %352 = vmatpush3.bf16.msra.mxu0 %v351_v17 }
  0xe8   :  { %v125_v11 = vpop.f32.mrb[0].mxu1 }
  0xe9   :  { %v126_v12 = vadd.f32 %v304_v10, %v125_v11  ;;  %v325_v13 = vpop.f32.mrb[1].mxu1 }
  0xeb   :  { %v129_v14 = vmax.f32 %v126_v12, 0.0 }
  0xed   :  { %331 = vmatmul.mubr.msk.f32.vlgmr.msra.gmra.mrb[2].mxu1 %vm138_vm3, %v129_v14 }
 0x1c0   :  { %v208_v19 = vpop.f32.mrb[2].mxu1 }
 0x1c1   :  { %v209_v20 = vadd.f32 %v307_v18, %v208_v19  ;;  %v332_v21 = vpop.f32.mrb[3].mxu1 }
 0x1c3   :  { %v212_v22 = vmax.f32 %v209_v20, 0.0 }
 0x1c5   :  { %342 = vmatmul.mubr.msk.f32.vlgmr.msra.gmra.mrb[0].mxu0 %vm223_vm4, %v212_v22 }
 0x298   :  { %v293_v24 = vpop.f32.mrb[0].mxu0 }
 0x299   :  { %v294_v25 = vadd.f32 %v309_v23, %v293_v24  ;;  %v343_v26 = vpop.f32.mrb[1].mxu0 }
 0x29b   :  { %298 = vst.msk [vmem:[%s472_s7] sm:$0xff] %vm297_vm5, %v294_v25 }
 0x29c   :  { %303 = vsyncpa [#allocation3], 1 }

</bundles_post_ra>
